<compile_context>
chip_gen: v7x
topology: tpu7x:2x2x1
jax: 0.10.0
libtpu: 0.0.40
codegen_flags: <defaults>
</compile_context>

<pallas_src>
import numpy as np
import jax
import jax.numpy as jnp
from jax.experimental import pallas as pl
from jax.experimental.pallas import tpu as pltpu

_LANES = 128
_SUBLANES_32BIT = 8
# ~4 MiB per block: large enough that the read+write DMA dwarfs the ~0.35 us
# per-grid-step overhead (>=90% of HBM roofline on large tensors), small enough
# that in + out double-buffered blocks (16 MiB) fit comfortably under a 32 MiB
# scoped VMEM limit on v5e/v6e (128 MiB physical) and v7x (64 MiB physical/TC).
_BLOCK_BYTES = 4 * 1024 * 1024
_VMEM_LIMIT_BYTES = 32 * 1024 * 1024
# Below this, custom-call launch overhead dominates; let XLA fuse -coeff*g.
_SMALL_BYTES = 256 * 1024


def _round_up(x: int, m: int) -> int:
    return ((x + m - 1) // m) * m


def _neg_scale_kernel(neg_coeff_ref, g_ref, o_ref):
    # neg_coeff_ref: (1,) f32 in SMEM (scalar prefetch).
    # g_ref / o_ref: (block_rows, 128) VMEM tiles in the cotangent's native
    # dtype.  Scalar is hoisted and cast once per block so the tile never gets
    # promoted to f32 (keeps bf16 in native (16,128) packing); one VPU multiply
    # per element is the only per-element op.
    s = neg_coeff_ref[0].astype(o_ref.dtype)
    o_ref[...] = g_ref[...] * s


def _neg_scale(slab: jax.Array, neg_coeff: jax.Array, block_rows: int) -> jax.Array:
    """slab: (rows, 128); returns slab * neg_coeff (same shape / dtype)."""
    rows, lanes = slab.shape
    n = rows * lanes
    itemsize = slab.dtype.itemsize
    grid = (pl.cdiv(rows, block_rows),)  # ragged last block handled by Pallas
    return pl.pallas_call(
        _neg_scale_kernel,
        out_shape=jax.ShapeDtypeStruct(slab.shape, slab.dtype),
        grid_spec=pltpu.PrefetchScalarGridSpec(
            num_scalar_prefetch=1,
            grid=grid,
            in_specs=[pl.BlockSpec((block_rows, _LANES), lambda i, s: (i, 0))],
            out_specs=pl.BlockSpec((block_rows, _LANES), lambda i, s: (i, 0)),
        ),
        compiler_params=pltpu.CompilerParams(
            # Independent blocks -> parallel; lets the runtime shard the grid
            # across v7x's two TensorCores.
            dimension_semantics=("parallel",),
            vmem_limit_bytes=_VMEM_LIMIT_BYTES,
        ),
        # Bandwidth-bound hint for XLA's scheduler: one mul/elem, 2 HBM passes.
        cost_estimate=pl.CostEstimate(
            flops=n, transcendentals=0, bytes_accessed=2 * n * itemsize),
    )(neg_coeff, slab)


@jax.custom_vjp
def grad_reverse(x: jax.Array, coeff: jax.Array) -> jax.Array:
    # Forward is the identity -- no kernel, no HBM traffic.
    del coeff
    return x


def _grad_reverse_fwd(x, coeff):
    return x, (coeff,)


def _grad_reverse_bwd(res, g):
    (coeff,) = res
    dtype = g.dtype
    n = int(np.prod(g.shape)) if g.shape else 1
    itemsize = jnp.dtype(dtype).itemsize
    neg_coeff = (-coeff).astype(jnp.float32)

    # Fallback: unaligned (n % 128 != 0) or small cotangents go through plain
    # JAX; XLA fuses the scalar multiply into a single HBM pass with no
    # custom-call / pad / slice overhead.
    if (n % _LANES != 0) or (n * itemsize < _SMALL_BYTES):
        dx = (g * neg_coeff.astype(dtype)).astype(dtype)
        return dx, jnp.zeros_like(coeff)

    rows = n // _LANES
    # dtype-native sublane packing: 8 for 32-bit, 16 for bf16, 32 for 8-bit.
    sublanes = max(_SUBLANES_32BIT, 32 // itemsize)
    budget_rows = max(_BLOCK_BYTES // (_LANES * itemsize), sublanes)
    block_rows = _round_up(min(budget_rows, _round_up(rows, sublanes)), sublanes)

    slab = g.reshape(rows, _LANES)  # pure view-shape change, no extra HBM pass
    out = _neg_scale(slab, neg_coeff.reshape(1), block_rows)
    dx = out.reshape(g.shape)
    return dx, jnp.zeros_like(coeff)


grad_reverse.defvjp(_grad_reverse_fwd, _grad_reverse_bwd)


class WarmStartGradientReverseLayer:
    """JAX/Pallas port of the PyTorch WarmStartGradientReverseLayer."""

    def __init__(self, alpha=1.0, lo=0.0, hi=1.0, max_iters=1000.0,
                 auto_step=False):
        self.alpha = alpha
        self.lo = lo
        self.hi = hi
        self.iter_num = 0
        self.max_iters = max_iters
        self.auto_step = auto_step

    def __call__(self, x: jax.Array) -> jax.Array:
        coeff = float(
            2.0 * (self.hi - self.lo)
            / (1.0 + np.exp(-self.alpha * self.iter_num / self.max_iters))
            - (self.hi - self.lo) + self.lo
        )
        if self.auto_step:
            self.step()
        return grad_reverse(x, jnp.asarray(coeff, dtype=jnp.float32))

    def step(self):
        self.iter_num += 1


if __name__ == "__main__":
    key = jax.random.PRNGKey(0)
    k1, k2, k3 = jax.random.split(key, 3)

    # --- Small NCHW input consistent with the module: batch=2, channels=4, 16x16.
    x = jax.random.normal(k1, (2, 4, 16, 16), dtype=jnp.float32)

    layer = WarmStartGradientReverseLayer(alpha=1.0, lo=0.0, hi=1.0,
                                          max_iters=1000, auto_step=True)

    # Forward must be the identity (no kernel launched here).
    y = jax.block_until_ready(layer(x))
    assert y.shape == x.shape and y.dtype == x.dtype
    np.testing.assert_allclose(np.asarray(y), np.asarray(x), rtol=0, atol=0)

    # Backward, small cotangent -> fused-XLA fallback path: dR/dx = -coeff * I.
    coeff_small = jnp.asarray(0.5, dtype=jnp.float32)
    g_small = jax.grad(lambda a: jnp.sum(grad_reverse(a, coeff_small)))(x)
    g_small = jax.block_until_ready(g_small)
    np.testing.assert_allclose(np.asarray(g_small),
                               -0.5 * np.ones(x.shape, np.float32),
                               rtol=1e-6, atol=1e-6)

    # Backward, 1 MiB cotangent (262144 f32 elems, lane-aligned) -> Pallas path.
    x_big = jax.random.normal(k2, (4, 16, 64, 64), dtype=jnp.float32)
    coeff_big = jnp.asarray(0.7, dtype=jnp.float32)
    _, vjp_fn = jax.vjp(lambda a: grad_reverse(a, coeff_big), x_big)
    ct = jax.random.normal(k3, x_big.shape, dtype=jnp.float32)
    (dx_big, _unused) = vjp_fn(ct)[0], None
    dx_big = jax.block_until_ready(dx_big)
    np.testing.assert_allclose(np.asarray(dx_big),
                               -0.7 * np.asarray(ct),
                               rtol=1e-6, atol=1e-6)

    print("KERNEL_OK")
</pallas_src>

<mosaic_0001>
module attributes {stable_mosaic.version = 11 : i64} {
  func.func @_neg_scale_kernel(%arg0: i32, %arg1: memref<1xf32, #tpu.memory_space<smem>>, %arg2: memref<2048x128xf32, #tpu.memory_space<vmem>>, %arg3: memref<2048x128xf32, #tpu.memory_space<vmem>>) attributes {dimension_semantics = [#tpu.dimension_semantics<parallel>], iteration_bounds = array<i64: 1>, scalar_prefetch = 1 : i64, scratch_operands = 0 : i64, tpu.core_type = #tpu.core_type<tc>, window_params = [{transform_indices = @transform_0, window_bounds = array<i64: 2048, 128>}, {transform_indices = @transform_1, window_bounds = array<i64: 2048, 128>}]} {
    %c0 = arith.constant 0 : index
    %0 = memref.load %arg1[%c0] : memref<1xf32, #tpu.memory_space<smem>>
    %c0_0 = arith.constant 0 : index
    %c0_1 = arith.constant 0 : index
    %1 = vector.load %arg2[%c0_0, %c0_1] : memref<2048x128xf32, #tpu.memory_space<vmem>>, vector<2048x128xf32>
    %2 = vector.broadcast %0 : f32 to vector<2048x128xf32>
    %3 = arith.mulf %1, %2 : vector<2048x128xf32>
    %c0_2 = arith.constant 0 : index
    %c0_3 = arith.constant 0 : index
    %4 = vector.load %arg3[%c0_2, %c0_3] : memref<2048x128xf32, #tpu.memory_space<vmem>>, vector<2048x128xf32>
    tpu.vector_store %arg3[%c0_2, %c0_3], %3 {strides = array<i32>} : memref<2048x128xf32, #tpu.memory_space<vmem>>, vector<2048x128xf32>,
    return
  }
  func.func @transform_0(%arg0: i32, %arg1: memref<1xf32, #tpu.memory_space<smem>>) -> (i32, i32) {
    %c0_i32 = arith.constant 0 : i32
    %c0_i32_0 = arith.constant 0 : i32
    return %arg0, %c0_i32 : i32, i32
  }
  func.func @transform_1(%arg0: i32, %arg1: memref<1xf32, #tpu.memory_space<smem>>) -> (i32, i32) {
    %c0_i32 = arith.constant 0 : i32
    %c0_i32_0 = arith.constant 0 : i32
    return %arg0, %c0_i32 : i32, i32
  }
}

</mosaic_0001>

<bundles_post_ra>
// kernel: tpu_custom_call.1
= control target key start
LH: loop header
LB: loop body
LE: loop exit
PB: predicated region body
PF: predicated region fallthrough
CT: control target
= control target key end

     0   :  { %8 = vsyncpa [#allocation5], 0  ;;  %s1174_s0 = inlined_call_operand.<no memory space> [shape: f32[1], index: 0, kind: input, shape index: {}]   ;;  %s1175_s1 = inlined_call_operand.hbm [shape: f32[2048,128], index: 1, kind: input, shape index: {}]   ;;  %s1176_s2 = inlined_call_operand.hbm [shape: f32[2048,128], index: 2, kind: output, shape index: {}]  }
   0x1   :  { %9 = vsyncpa [#allocation6], 0  ;;  %s864_s9 = smov [#allocation4]   ;;  %s816_s13 = scalar_lea.hbm %s1175_s1, 32768 }
   0x2   :  { %s15_s10 = sshll.u32 %s864_s9, 4  ;;  %p817_p0 = scmp.ne.s32.totalorder %s1175_s1, %s816_s13  ;;  %s16_s10 = int_to_ptr.vmem [resolvable:$true] %s15_s10 }
   0x3   :  { %p820_p1 = scmp.lt.u32.totalorder %s816_s13, %s1175_s1 }
   0x5   :  { %p822_p2 = pnand %p820_p1, %p817_p0 }
   0x7   :  { %825 = shalt.err (!%p822_p2)
}
   0x8   :  { %s826_s18 = scalar_lea.vmem %s16_s10, 32768  ;;  %p831_p4 = scmp.lt.s32.totalorder %s16_s10, %s16_s10 }
   0x9   :  { %p827_p3 = scmp.ne.s32.totalorder %s16_s10, %s826_s18  ;;  %p832_p5 = scmp.lt.s32.totalorder %s826_s18, %s826_s18 }
   0xb   :  { %p833_p6 = por %p832_p5, %p831_p4 }
   0xd   :  { %p834_p7 = pnand %p833_p6, %p827_p3 }
   0xf   :  { %837 = shalt.err (!%p834_p7)
}
  0x10   :  { %s865_s19 = smov 128   ;;  %s866_s20 = smov 8  }
  0x11   :  { %21 = dma.hbm_to_vmem [thread:$0]  %s1175_s1, 32768, %s16_s10, [#allocation5], %s865_s19, %s865_s19, %s866_s20  }
  0x12   :  { %860 = dma.done.wait [#allocation5], 32768  }
  0x13   :  { %861 = vsyncadd [#allocation5], 4294934528  ;;  %v901_v0 = vstv %s1174_s0  ;;  %v26_v1 = vld [vmem:[#allocation4] sm:$0xff]  ;;  %v27_v2 = vld [vmem:[#allocation4 + $0x8] sm:$0xff]  ;;  %s867_s0 = smov [#allocation7]  }
  0x14   :  { %v28_v3 = vld [vmem:[#allocation4 + $0x10] sm:$0xff]  ;;  %v283_v4 = vmul.f32 %v901_v0, %v26_v1  ;;  %v284_v5 = vmul.f32 %v901_v0, %v27_v2  ;;  %v29_v7 = vld [vmem:[#allocation4 + $0x18] sm:$0xff]  ;;  %v30_v8 = vld [vmem:[#allocation4 + $0x20] sm:$0xff]  ;;  %s800_s1 = sshll.u32 %s867_s0, 4  ;;  %s801_s1 = int_to_ptr.vmem [resolvable:$true] %s800_s1 }
  0x15   :  { %v285_v6 = vmul.f32 %v901_v0, %v28_v3  ;;  %v31_v9 = vld [vmem:[#allocation4 + $0x28] sm:$0xff]  ;;  %v286_v10 = vmul.f32 %v901_v0, %v29_v7  ;;  %v287_v11 = vmul.f32 %v901_v0, %v30_v8  ;;  %v32_v13 = vld [vmem:[#allocation4 + $0x30] sm:$0xff]  ;;  %v33_v14 = vld [vmem:[#allocation4 + $0x38] sm:$0xff]  ;;  %s838_s25 = scalar_lea.vmem %s801_s1, 32768  ;;  %p843_p9 = scmp.lt.s32.totalorder %s801_s1, %s801_s1 }
  0x16   :  { %v288_v12 = vmul.f32 %v901_v0, %v31_v9  ;;  %v34_v15 = vld [vmem:[#allocation4 + $0x40] sm:$0xff]  ;;  %539 = vst [vmem:[#allocation7] sm:$0xff] %v283_v4  ;;  %540 = vst [vmem:[#allocation7 + $0x8] sm:$0xff] %v284_v5  ;;  %v289_v16 = vmul.f32 %v901_v0, %v32_v13  ;;  %v290_v17 = vmul.f32 %v901_v0, %v33_v14  ;;  %v35_v19 = vld [vmem:[#allocation4 + $0x48] sm:$0xff]  ;;  %p839_p8 = scmp.ne.s32.totalorder %s801_s1, %s838_s25  ;;  %p844_p10 = scmp.lt.s32.totalorder %s838_s25, %s838_s25 }
  0x17   :  { %541 = vst [vmem:[#allocation7 + $0x10] sm:$0xff] %v285_v6  ;;  %v291_v18 = vmul.f32 %v901_v0, %v34_v15  ;;  %v36_v20 = vld [vmem:[#allocation4 + $0x50] sm:$0xff]  ;;  %v37_v21 = vld [vmem:[#allocation4 + $0x58] sm:$0xff]  ;;  %542 = vst [vmem:[#allocation7 + $0x18] sm:$0xff] %v286_v10  ;;  %v292_v22 = vmul.f32 %v901_v0, %v35_v19 }
  0x18   :  { %543 = vst [vmem:[#allocation7 + $0x20] sm:$0xff] %v287_v11  ;;  %544 = vst [vmem:[#allocation7 + $0x28] sm:$0xff] %v288_v12  ;;  %v293_v23 = vmul.f32 %v901_v0, %v36_v20  ;;  %v294_v24 = vmul.f32 %v901_v0, %v37_v21  ;;  %v38_v25 = vld [vmem:[#allocation4 + $0x60] sm:$0xff]  ;;  %v39_v26 = vld [vmem:[#allocation4 + $0x68] sm:$0xff]  ;;  %p845_p11 = por %p844_p10, %p843_p9 }
  0x19   :  { %v40_v27 = vld [vmem:[#allocation4 + $0x70] sm:$0xff]  ;;  %545 = vst [vmem:[#allocation7 + $0x30] sm:$0xff] %v289_v16  ;;  %546 = vst [vmem:[#allocation7 + $0x38] sm:$0xff] %v290_v17  ;;  %v295_v28 = vmul.f32 %v901_v0, %v38_v25  ;;  %v296_v29 = vmul.f32 %v901_v0, %v39_v26  ;;  %v41_v31 = vld [vmem:[#allocation4 + $0x78] sm:$0xff] }
  0x1a   :  { %547 = vst [vmem:[#allocation7 + $0x40] sm:$0xff] %v291_v18  ;;  %v297_v30 = vmul.f32 %v901_v0, %v40_v27  ;;  %v42_v32 = vld [vmem:[#allocation4 + $0x80] sm:$0xff]  ;;  %v43_v33 = vld [vmem:[#allocation4 + $0x88] sm:$0xff]  ;;  %548 = vst [vmem:[#allocation7 + $0x48] sm:$0xff] %v292_v22  ;;  %v298_v34 = vmul.f32 %v901_v0, %v41_v31  ;;  %p846_p12 = pnand %p845_p11, %p839_p8 }
  0x1b   :  { %549 = vst [vmem:[#allocation7 + $0x50] sm:$0xff] %v293_v23  ;;  %550 = vst [vmem:[#allocation7 + $0x58] sm:$0xff] %v294_v24  ;;  %v299_v35 = vmul.f32 %v901_v0, %v42_v32  ;;  %v300_v36 = vmul.f32 %v901_v0, %v43_v33  ;;  %v44_v37 = vld [vmem:[#allocation4 + $0x90] sm:$0xff]  ;;  %v45_v38 = vld [vmem:[#allocation4 + $0x98] sm:$0xff] }
  0x1c   :  { %v46_v39 = vld [vmem:[#allocation4 + $0xa0] sm:$0xff]  ;;  %551 = vst [vmem:[#allocation7 + $0x60] sm:$0xff] %v295_v28  ;;  %552 = vst [vmem:[#allocation7 + $0x68] sm:$0xff] %v296_v29  ;;  %v301_v40 = vmul.f32 %v901_v0, %v44_v37  ;;  %v302_v41 = vmul.f32 %v901_v0, %v45_v38  ;;  %v47_v43 = vld [vmem:[#allocation4 + $0xa8] sm:$0xff] }
  0x1d   :  { %553 = vst [vmem:[#allocation7 + $0x70] sm:$0xff] %v297_v30  ;;  %v303_v42 = vmul.f32 %v901_v0, %v46_v39  ;;  %v48_v44 = vld [vmem:[#allocation4 + $0xb0] sm:$0xff]  ;;  %v49_v45 = vld [vmem:[#allocation4 + $0xb8] sm:$0xff]  ;;  %554 = vst [vmem:[#allocation7 + $0x78] sm:$0xff] %v298_v34  ;;  %v304_v46 = vmul.f32 %v901_v0, %v47_v43 }
  0x1e   :  { %555 = vst [vmem:[#allocation7 + $0x80] sm:$0xff] %v299_v35  ;;  %556 = vst [vmem:[#allocation7 + $0x88] sm:$0xff] %v300_v36  ;;  %v305_v47 = vmul.f32 %v901_v0, %v48_v44  ;;  %v306_v48 = vmul.f32 %v901_v0, %v49_v45  ;;  %v50_v49 = vld [vmem:[#allocation4 + $0xc0] sm:$0xff]  ;;  %v51_v50 = vld [vmem:[#allocation4 + $0xc8] sm:$0xff] }
  0x1f   :  { %v52_v51 = vld [vmem:[#allocation4 + $0xd0] sm:$0xff]  ;;  %557 = vst [vmem:[#allocation7 + $0x90] sm:$0xff] %v301_v40  ;;  %558 = vst [vmem:[#allocation7 + $0x98] sm:$0xff] %v302_v41  ;;  %v307_v52 = vmul.f32 %v901_v0, %v50_v49  ;;  %v308_v53 = vmul.f32 %v901_v0, %v51_v50  ;;  %v53_v55 = vld [vmem:[#allocation4 + $0xd8] sm:$0xff] }
  0x20   :  { %559 = vst [vmem:[#allocation7 + $0xa0] sm:$0xff] %v303_v42  ;;  %v309_v54 = vmul.f32 %v901_v0, %v52_v51  ;;  %v54_v56 = vld [vmem:[#allocation4 + $0xe0] sm:$0xff]  ;;  %v55_v57 = vld [vmem:[#allocation4 + $0xe8] sm:$0xff]  ;;  %560 = vst [vmem:[#allocation7 + $0xa8] sm:$0xff] %v304_v46  ;;  %v310_v58 = vmul.f32 %v901_v0, %v53_v55 }
  0x21   :  { %561 = vst [vmem:[#allocation7 + $0xb0] sm:$0xff] %v305_v47  ;;  %562 = vst [vmem:[#allocation7 + $0xb8] sm:$0xff] %v306_v48  ;;  %v311_v59 = vmul.f32 %v901_v0, %v54_v56  ;;  %v312_v60 = vmul.f32 %v901_v0, %v55_v57  ;;  %v56_v61 = vld [vmem:[#allocation4 + $0xf0] sm:$0xff]  ;;  %v57_v62 = vld [vmem:[#allocation4 + $0xf8] sm:$0xff] }
  0x22   :  { %v58_v63 = vld [vmem:[#allocation4 + $0x100] sm:$0xff]  ;;  %563 = vst [vmem:[#allocation7 + $0xc0] sm:$0xff] %v307_v52  ;;  %564 = vst [vmem:[#allocation7 + $0xc8] sm:$0xff] %v308_v53  ;;  %v313_v1 = vmul.f32 %v901_v0, %v56_v61  ;;  %v314_v2 = vmul.f32 %v901_v0, %v57_v62  ;;  %v59_v4 = vld [vmem:[#allocation4 + $0x108] sm:$0xff] }
  0x23   :  { %565 = vst [vmem:[#allocation7 + $0xd0] sm:$0xff] %v309_v54  ;;  %v315_v3 = vmul.f32 %v901_v0, %v58_v63  ;;  %v60_v5 = vld [vmem:[#allocation4 + $0x110] sm:$0xff]  ;;  %v61_v6 = vld [vmem:[#allocation4 + $0x118] sm:$0xff]  ;;  %566 = vst [vmem:[#allocation7 + $0xd8] sm:$0xff] %v310_v58  ;;  %v316_v7 = vmul.f32 %v901_v0, %v59_v4 }
  0x24   :  { %567 = vst [vmem:[#allocation7 + $0xe0] sm:$0xff] %v311_v59  ;;  %568 = vst [vmem:[#allocation7 + $0xe8] sm:$0xff] %v312_v60  ;;  %v317_v8 = vmul.f32 %v901_v0, %v60_v5  ;;  %v318_v9 = vmul.f32 %v901_v0, %v61_v6  ;;  %v62_v10 = vld [vmem:[#allocation4 + $0x120] sm:$0xff]  ;;  %v63_v11 = vld [vmem:[#allocation4 + $0x128] sm:$0xff] }
  0x25   :  { %v64_v12 = vld [vmem:[#allocation4 + $0x130] sm:$0xff]  ;;  %569 = vst [vmem:[#allocation7 + $0xf0] sm:$0xff] %v313_v1  ;;  %570 = vst [vmem:[#allocation7 + $0xf8] sm:$0xff] %v314_v2  ;;  %v319_v13 = vmul.f32 %v901_v0, %v62_v10  ;;  %v320_v14 = vmul.f32 %v901_v0, %v63_v11  ;;  %v65_v16 = vld [vmem:[#allocation4 + $0x138] sm:$0xff] }
  0x26   :  { %571 = vst [vmem:[#allocation7 + $0x100] sm:$0xff] %v315_v3  ;;  %v321_v15 = vmul.f32 %v901_v0, %v64_v12  ;;  %v66_v17 = vld [vmem:[#allocation4 + $0x140] sm:$0xff]  ;;  %v67_v18 = vld [vmem:[#allocation4 + $0x148] sm:$0xff]  ;;  %572 = vst [vmem:[#allocation7 + $0x108] sm:$0xff] %v316_v7  ;;  %v322_v19 = vmul.f32 %v901_v0, %v65_v16 }
  0x27   :  { %573 = vst [vmem:[#allocation7 + $0x110] sm:$0xff] %v317_v8  ;;  %574 = vst [vmem:[#allocation7 + $0x118] sm:$0xff] %v318_v9  ;;  %v323_v20 = vmul.f32 %v901_v0, %v66_v17  ;;  %v324_v21 = vmul.f32 %v901_v0, %v67_v18  ;;  %v68_v22 = vld [vmem:[#allocation4 + $0x150] sm:$0xff]  ;;  %v69_v23 = vld [vmem:[#allocation4 + $0x158] sm:$0xff] }
  0x28   :  { %v70_v24 = vld [vmem:[#allocation4 + $0x160] sm:$0xff]  ;;  %575 = vst [vmem:[#allocation7 + $0x120] sm:$0xff] %v319_v13  ;;  %576 = vst [vmem:[#allocation7 + $0x128] sm:$0xff] %v320_v14  ;;  %v325_v25 = vmul.f32 %v901_v0, %v68_v22  ;;  %v326_v26 = vmul.f32 %v901_v0, %v69_v23  ;;  %v71_v28 = vld [vmem:[#allocation4 + $0x168] sm:$0xff] }
  0x29   :  { %577 = vst [vmem:[#allocation7 + $0x130] sm:$0xff] %v321_v15  ;;  %v327_v27 = vmul.f32 %v901_v0, %v70_v24  ;;  %v72_v29 = vld [vmem:[#allocation4 + $0x170] sm:$0xff]  ;;  %v73_v30 = vld [vmem:[#allocation4 + $0x178] sm:$0xff]  ;;  %578 = vst [vmem:[#allocation7 + $0x138] sm:$0xff] %v322_v19  ;;  %v328_v31 = vmul.f32 %v901_v0, %v71_v28 }
  0x2a   :  { %579 = vst [vmem:[#allocation7 + $0x140] sm:$0xff] %v323_v20  ;;  %580 = vst [vmem:[#allocation7 + $0x148] sm:$0xff] %v324_v21  ;;  %v329_v32 = vmul.f32 %v901_v0, %v72_v29  ;;  %v330_v33 = vmul.f32 %v901_v0, %v73_v30  ;;  %v74_v34 = vld [vmem:[#allocation4 + $0x180] sm:$0xff]  ;;  %v75_v35 = vld [vmem:[#allocation4 + $0x188] sm:$0xff] }
  0x2b   :  { %v76_v36 = vld [vmem:[#allocation4 + $0x190] sm:$0xff]  ;;  %581 = vst [vmem:[#allocation7 + $0x150] sm:$0xff] %v325_v25  ;;  %582 = vst [vmem:[#allocation7 + $0x158] sm:$0xff] %v326_v26  ;;  %v331_v37 = vmul.f32 %v901_v0, %v74_v34  ;;  %v332_v38 = vmul.f32 %v901_v0, %v75_v35  ;;  %v77_v40 = vld [vmem:[#allocation4 + $0x198] sm:$0xff] }
  0x2c   :  { %583 = vst [vmem:[#allocation7 + $0x160] sm:$0xff] %v327_v27  ;;  %v333_v39 = vmul.f32 %v901_v0, %v76_v36  ;;  %v78_v41 = vld [vmem:[#allocation4 + $0x1a0] sm:$0xff]  ;;  %v79_v42 = vld [vmem:[#allocation4 + $0x1a8] sm:$0xff]  ;;  %584 = vst [vmem:[#allocation7 + $0x168] sm:$0xff] %v328_v31  ;;  %v334_v43 = vmul.f32 %v901_v0, %v77_v40 }
  0x2d   :  { %585 = vst [vmem:[#allocation7 + $0x170] sm:$0xff] %v329_v32  ;;  %586 = vst [vmem:[#allocation7 + $0x178] sm:$0xff] %v330_v33  ;;  %v335_v44 = vmul.f32 %v901_v0, %v78_v41  ;;  %v336_v45 = vmul.f32 %v901_v0, %v79_v42  ;;  %v80_v46 = vld [vmem:[#allocation4 + $0x1b0] sm:$0xff]  ;;  %v81_v47 = vld [vmem:[#allocation4 + $0x1b8] sm:$0xff] }
  0x2e   :  { %v82_v48 = vld [vmem:[#allocation4 + $0x1c0] sm:$0xff]  ;;  %587 = vst [vmem:[#allocation7 + $0x180] sm:$0xff] %v331_v37  ;;  %588 = vst [vmem:[#allocation7 + $0x188] sm:$0xff] %v332_v38  ;;  %v337_v49 = vmul.f32 %v901_v0, %v80_v46  ;;  %v338_v50 = vmul.f32 %v901_v0, %v81_v47  ;;  %v83_v52 = vld [vmem:[#allocation4 + $0x1c8] sm:$0xff] }
  0x2f   :  { %589 = vst [vmem:[#allocation7 + $0x190] sm:$0xff] %v333_v39  ;;  %v339_v51 = vmul.f32 %v901_v0, %v82_v48  ;;  %v84_v53 = vld [vmem:[#allocation4 + $0x1d0] sm:$0xff]  ;;  %v85_v54 = vld [vmem:[#allocation4 + $0x1d8] sm:$0xff]  ;;  %590 = vst [vmem:[#allocation7 + $0x198] sm:$0xff] %v334_v43  ;;  %v340_v55 = vmul.f32 %v901_v0, %v83_v52 }
  0x30   :  { %591 = vst [vmem:[#allocation7 + $0x1a0] sm:$0xff] %v335_v44  ;;  %592 = vst [vmem:[#allocation7 + $0x1a8] sm:$0xff] %v336_v45  ;;  %v341_v56 = vmul.f32 %v901_v0, %v84_v53  ;;  %v342_v57 = vmul.f32 %v901_v0, %v85_v54  ;;  %v86_v58 = vld [vmem:[#allocation4 + $0x1e0] sm:$0xff]  ;;  %v87_v59 = vld [vmem:[#allocation4 + $0x1e8] sm:$0xff] }
  0x31   :  { %v88_v60 = vld [vmem:[#allocation4 + $0x1f0] sm:$0xff]  ;;  %593 = vst [vmem:[#allocation7 + $0x1b0] sm:$0xff] %v337_v49  ;;  %594 = vst [vmem:[#allocation7 + $0x1b8] sm:$0xff] %v338_v50  ;;  %v343_v61 = vmul.f32 %v901_v0, %v86_v58  ;;  %v344_v62 = vmul.f32 %v901_v0, %v87_v59  ;;  %v89_v1 = vld [vmem:[#allocation4 + $0x1f8] sm:$0xff] }
  0x32   :  { %595 = vst [vmem:[#allocation7 + $0x1c0] sm:$0xff] %v339_v51  ;;  %v345_v63 = vmul.f32 %v901_v0, %v88_v60  ;;  %v90_v2 = vld [vmem:[#allocation4 + $0x200] sm:$0xff]  ;;  %v91_v3 = vld [vmem:[#allocation4 + $0x208] sm:$0xff]  ;;  %596 = vst [vmem:[#allocation7 + $0x1c8] sm:$0xff] %v340_v55  ;;  %v346_v4 = vmul.f32 %v901_v0, %v89_v1 }
  0x33   :  { %597 = vst [vmem:[#allocation7 + $0x1d0] sm:$0xff] %v341_v56  ;;  %598 = vst [vmem:[#allocation7 + $0x1d8] sm:$0xff] %v342_v57  ;;  %v347_v5 = vmul.f32 %v901_v0, %v90_v2  ;;  %v348_v6 = vmul.f32 %v901_v0, %v91_v3  ;;  %v92_v7 = vld [vmem:[#allocation4 + $0x210] sm:$0xff]  ;;  %v93_v8 = vld [vmem:[#allocation4 + $0x218] sm:$0xff] }
  0x34   :  { %v94_v9 = vld [vmem:[#allocation4 + $0x220] sm:$0xff]  ;;  %599 = vst [vmem:[#allocation7 + $0x1e0] sm:$0xff] %v343_v61  ;;  %600 = vst [vmem:[#allocation7 + $0x1e8] sm:$0xff] %v344_v62  ;;  %v349_v10 = vmul.f32 %v901_v0, %v92_v7  ;;  %v350_v11 = vmul.f32 %v901_v0, %v93_v8  ;;  %v95_v13 = vld [vmem:[#allocation4 + $0x228] sm:$0xff] }
  0x35   :  { %601 = vst [vmem:[#allocation7 + $0x1f0] sm:$0xff] %v345_v63  ;;  %v351_v12 = vmul.f32 %v901_v0, %v94_v9  ;;  %v96_v14 = vld [vmem:[#allocation4 + $0x230] sm:$0xff]  ;;  %v97_v15 = vld [vmem:[#allocation4 + $0x238] sm:$0xff]  ;;  %602 = vst [vmem:[#allocation7 + $0x1f8] sm:$0xff] %v346_v4  ;;  %v352_v16 = vmul.f32 %v901_v0, %v95_v13 }
  0x36   :  { %603 = vst [vmem:[#allocation7 + $0x200] sm:$0xff] %v347_v5  ;;  %604 = vst [vmem:[#allocation7 + $0x208] sm:$0xff] %v348_v6  ;;  %v353_v17 = vmul.f32 %v901_v0, %v96_v14  ;;  %v354_v18 = vmul.f32 %v901_v0, %v97_v15  ;;  %v98_v19 = vld [vmem:[#allocation4 + $0x240] sm:$0xff]  ;;  %v99_v20 = vld [vmem:[#allocation4 + $0x248] sm:$0xff] }
  0x37   :  { %v100_v21 = vld [vmem:[#allocation4 + $0x250] sm:$0xff]  ;;  %605 = vst [vmem:[#allocation7 + $0x210] sm:$0xff] %v349_v10  ;;  %606 = vst [vmem:[#allocation7 + $0x218] sm:$0xff] %v350_v11  ;;  %v355_v22 = vmul.f32 %v901_v0, %v98_v19  ;;  %v356_v23 = vmul.f32 %v901_v0, %v99_v20  ;;  %v101_v25 = vld [vmem:[#allocation4 + $0x258] sm:$0xff] }
  0x38   :  { %607 = vst [vmem:[#allocation7 + $0x220] sm:$0xff] %v351_v12  ;;  %v357_v24 = vmul.f32 %v901_v0, %v100_v21  ;;  %v102_v26 = vld [vmem:[#allocation4 + $0x260] sm:$0xff]  ;;  %v103_v27 = vld [vmem:[#allocation4 + $0x268] sm:$0xff]  ;;  %608 = vst [vmem:[#allocation7 + $0x228] sm:$0xff] %v352_v16  ;;  %v358_v28 = vmul.f32 %v901_v0, %v101_v25 }
  0x39   :  { %609 = vst [vmem:[#allocation7 + $0x230] sm:$0xff] %v353_v17  ;;  %610 = vst [vmem:[#allocation7 + $0x238] sm:$0xff] %v354_v18  ;;  %v359_v29 = vmul.f32 %v901_v0, %v102_v26  ;;  %v360_v30 = vmul.f32 %v901_v0, %v103_v27  ;;  %v104_v31 = vld [vmem:[#allocation4 + $0x270] sm:$0xff]  ;;  %v105_v32 = vld [vmem:[#allocation4 + $0x278] sm:$0xff] }
  0x3a   :  { %v106_v33 = vld [vmem:[#allocation4 + $0x280] sm:$0xff]  ;;  %611 = vst [vmem:[#allocation7 + $0x240] sm:$0xff] %v355_v22  ;;  %612 = vst [vmem:[#allocation7 + $0x248] sm:$0xff] %v356_v23  ;;  %v361_v34 = vmul.f32 %v901_v0, %v104_v31  ;;  %v362_v35 = vmul.f32 %v901_v0, %v105_v32  ;;  %v107_v37 = vld [vmem:[#allocation4 + $0x288] sm:$0xff] }
  0x3b   :  { %613 = vst [vmem:[#allocation7 + $0x250] sm:$0xff] %v357_v24  ;;  %v363_v36 = vmul.f32 %v901_v0, %v106_v33  ;;  %v108_v38 = vld [vmem:[#allocation4 + $0x290] sm:$0xff]  ;;  %v109_v39 = vld [vmem:[#allocation4 + $0x298] sm:$0xff]  ;;  %614 = vst [vmem:[#allocation7 + $0x258] sm:$0xff] %v358_v28  ;;  %v364_v40 = vmul.f32 %v901_v0, %v107_v37 }
  0x3c   :  { %615 = vst [vmem:[#allocation7 + $0x260] sm:$0xff] %v359_v29  ;;  %616 = vst [vmem:[#allocation7 + $0x268] sm:$0xff] %v360_v30  ;;  %v365_v41 = vmul.f32 %v901_v0, %v108_v38  ;;  %v366_v42 = vmul.f32 %v901_v0, %v109_v39  ;;  %v110_v43 = vld [vmem:[#allocation4 + $0x2a0] sm:$0xff]  ;;  %v111_v44 = vld [vmem:[#allocation4 + $0x2a8] sm:$0xff] }
  0x3d   :  { %v112_v45 = vld [vmem:[#allocation4 + $0x2b0] sm:$0xff]  ;;  %617 = vst [vmem:[#allocation7 + $0x270] sm:$0xff] %v361_v34  ;;  %618 = vst [vmem:[#allocation7 + $0x278] sm:$0xff] %v362_v35  ;;  %v367_v46 = vmul.f32 %v901_v0, %v110_v43  ;;  %v368_v47 = vmul.f32 %v901_v0, %v111_v44  ;;  %v113_v49 = vld [vmem:[#allocation4 + $0x2b8] sm:$0xff] }
  0x3e   :  { %619 = vst [vmem:[#allocation7 + $0x280] sm:$0xff] %v363_v36  ;;  %v369_v48 = vmul.f32 %v901_v0, %v112_v45  ;;  %v114_v50 = vld [vmem:[#allocation4 + $0x2c0] sm:$0xff]  ;;  %v115_v51 = vld [vmem:[#allocation4 + $0x2c8] sm:$0xff]  ;;  %620 = vst [vmem:[#allocation7 + $0x288] sm:$0xff] %v364_v40  ;;  %v370_v52 = vmul.f32 %v901_v0, %v113_v49 }
  0x3f   :  { %621 = vst [vmem:[#allocation7 + $0x290] sm:$0xff] %v365_v41  ;;  %622 = vst [vmem:[#allocation7 + $0x298] sm:$0xff] %v366_v42  ;;  %v371_v53 = vmul.f32 %v901_v0, %v114_v50  ;;  %v372_v54 = vmul.f32 %v901_v0, %v115_v51  ;;  %v116_v55 = vld [vmem:[#allocation4 + $0x2d0] sm:$0xff]  ;;  %v117_v56 = vld [vmem:[#allocation4 + $0x2d8] sm:$0xff] }
  0x40   :  { %v118_v57 = vld [vmem:[#allocation4 + $0x2e0] sm:$0xff]  ;;  %623 = vst [vmem:[#allocation7 + $0x2a0] sm:$0xff] %v367_v46  ;;  %624 = vst [vmem:[#allocation7 + $0x2a8] sm:$0xff] %v368_v47  ;;  %v373_v58 = vmul.f32 %v901_v0, %v116_v55  ;;  %v374_v59 = vmul.f32 %v901_v0, %v117_v56  ;;  %v119_v61 = vld [vmem:[#allocation4 + $0x2e8] sm:$0xff] }
  0x41   :  { %625 = vst [vmem:[#allocation7 + $0x2b0] sm:$0xff] %v369_v48  ;;  %v375_v60 = vmul.f32 %v901_v0, %v118_v57  ;;  %v120_v62 = vld [vmem:[#allocation4 + $0x2f0] sm:$0xff]  ;;  %v121_v63 = vld [vmem:[#allocation4 + $0x2f8] sm:$0xff]  ;;  %626 = vst [vmem:[#allocation7 + $0x2b8] sm:$0xff] %v370_v52  ;;  %v376_v1 = vmul.f32 %v901_v0, %v119_v61 }
  0x42   :  { %627 = vst [vmem:[#allocation7 + $0x2c0] sm:$0xff] %v371_v53  ;;  %628 = vst [vmem:[#allocation7 + $0x2c8] sm:$0xff] %v372_v54  ;;  %v377_v2 = vmul.f32 %v901_v0, %v120_v62  ;;  %v378_v3 = vmul.f32 %v901_v0, %v121_v63  ;;  %v122_v4 = vld [vmem:[#allocation4 + $0x300] sm:$0xff]  ;;  %v123_v5 = vld [vmem:[#allocation4 + $0x308] sm:$0xff] }
  0x43   :  { %v124_v6 = vld [vmem:[#allocation4 + $0x310] sm:$0xff]  ;;  %629 = vst [vmem:[#allocation7 + $0x2d0] sm:$0xff] %v373_v58  ;;  %630 = vst [vmem:[#allocation7 + $0x2d8] sm:$0xff] %v374_v59  ;;  %v379_v7 = vmul.f32 %v901_v0, %v122_v4  ;;  %v380_v8 = vmul.f32 %v901_v0, %v123_v5  ;;  %v125_v10 = vld [vmem:[#allocation4 + $0x318] sm:$0xff] }
  0x44   :  { %631 = vst [vmem:[#allocation7 + $0x2e0] sm:$0xff] %v375_v60  ;;  %v381_v9 = vmul.f32 %v901_v0, %v124_v6  ;;  %v126_v11 = vld [vmem:[#allocation4 + $0x320] sm:$0xff]  ;;  %v127_v12 = vld [vmem:[#allocation4 + $0x328] sm:$0xff]  ;;  %632 = vst [vmem:[#allocation7 + $0x2e8] sm:$0xff] %v376_v1  ;;  %v382_v13 = vmul.f32 %v901_v0, %v125_v10 }
  0x45   :  { %633 = vst [vmem:[#allocation7 + $0x2f0] sm:$0xff] %v377_v2  ;;  %634 = vst [vmem:[#allocation7 + $0x2f8] sm:$0xff] %v378_v3  ;;  %v383_v14 = vmul.f32 %v901_v0, %v126_v11  ;;  %v384_v15 = vmul.f32 %v901_v0, %v127_v12  ;;  %v128_v16 = vld [vmem:[#allocation4 + $0x330] sm:$0xff]  ;;  %v129_v17 = vld [vmem:[#allocation4 + $0x338] sm:$0xff] }
  0x46   :  { %v130_v18 = vld [vmem:[#allocation4 + $0x340] sm:$0xff]  ;;  %635 = vst [vmem:[#allocation7 + $0x300] sm:$0xff] %v379_v7  ;;  %636 = vst [vmem:[#allocation7 + $0x308] sm:$0xff] %v380_v8  ;;  %v385_v19 = vmul.f32 %v901_v0, %v128_v16  ;;  %v386_v20 = vmul.f32 %v901_v0, %v129_v17  ;;  %v131_v22 = vld [vmem:[#allocation4 + $0x348] sm:$0xff] }
  0x47   :  { %637 = vst [vmem:[#allocation7 + $0x310] sm:$0xff] %v381_v9  ;;  %v387_v21 = vmul.f32 %v901_v0, %v130_v18  ;;  %v132_v23 = vld [vmem:[#allocation4 + $0x350] sm:$0xff]  ;;  %v133_v24 = vld [vmem:[#allocation4 + $0x358] sm:$0xff]  ;;  %638 = vst [vmem:[#allocation7 + $0x318] sm:$0xff] %v382_v13  ;;  %v388_v25 = vmul.f32 %v901_v0, %v131_v22 }
  0x48   :  { %639 = vst [vmem:[#allocation7 + $0x320] sm:$0xff] %v383_v14  ;;  %640 = vst [vmem:[#allocation7 + $0x328] sm:$0xff] %v384_v15  ;;  %v389_v26 = vmul.f32 %v901_v0, %v132_v23  ;;  %v390_v27 = vmul.f32 %v901_v0, %v133_v24  ;;  %v134_v28 = vld [vmem:[#allocation4 + $0x360] sm:$0xff]  ;;  %v135_v29 = vld [vmem:[#allocation4 + $0x368] sm:$0xff] }
  0x49   :  { %v136_v30 = vld [vmem:[#allocation4 + $0x370] sm:$0xff]  ;;  %641 = vst [vmem:[#allocation7 + $0x330] sm:$0xff] %v385_v19  ;;  %642 = vst [vmem:[#allocation7 + $0x338] sm:$0xff] %v386_v20  ;;  %v391_v31 = vmul.f32 %v901_v0, %v134_v28  ;;  %v392_v32 = vmul.f32 %v901_v0, %v135_v29  ;;  %v137_v34 = vld [vmem:[#allocation4 + $0x378] sm:$0xff] }
  0x4a   :  { %643 = vst [vmem:[#allocation7 + $0x340] sm:$0xff] %v387_v21  ;;  %v393_v33 = vmul.f32 %v901_v0, %v136_v30  ;;  %v138_v35 = vld [vmem:[#allocation4 + $0x380] sm:$0xff]  ;;  %v139_v36 = vld [vmem:[#allocation4 + $0x388] sm:$0xff]  ;;  %644 = vst [vmem:[#allocation7 + $0x348] sm:$0xff] %v388_v25  ;;  %v394_v37 = vmul.f32 %v901_v0, %v137_v34 }
  0x4b   :  { %645 = vst [vmem:[#allocation7 + $0x350] sm:$0xff] %v389_v26  ;;  %646 = vst [vmem:[#allocation7 + $0x358] sm:$0xff] %v390_v27  ;;  %v395_v38 = vmul.f32 %v901_v0, %v138_v35  ;;  %v396_v39 = vmul.f32 %v901_v0, %v139_v36  ;;  %v140_v40 = vld [vmem:[#allocation4 + $0x390] sm:$0xff]  ;;  %v141_v41 = vld [vmem:[#allocation4 + $0x398] sm:$0xff] }
  0x4c   :  { %v142_v42 = vld [vmem:[#allocation4 + $0x3a0] sm:$0xff]  ;;  %647 = vst [vmem:[#allocation7 + $0x360] sm:$0xff] %v391_v31  ;;  %648 = vst [vmem:[#allocation7 + $0x368] sm:$0xff] %v392_v32  ;;  %v397_v43 = vmul.f32 %v901_v0, %v140_v40  ;;  %v398_v44 = vmul.f32 %v901_v0, %v141_v41  ;;  %v143_v46 = vld [vmem:[#allocation4 + $0x3a8] sm:$0xff] }
  0x4d   :  { %649 = vst [vmem:[#allocation7 + $0x370] sm:$0xff] %v393_v33  ;;  %v399_v45 = vmul.f32 %v901_v0, %v142_v42  ;;  %v144_v47 = vld [vmem:[#allocation4 + $0x3b0] sm:$0xff]  ;;  %v145_v48 = vld [vmem:[#allocation4 + $0x3b8] sm:$0xff]  ;;  %650 = vst [vmem:[#allocation7 + $0x378] sm:$0xff] %v394_v37  ;;  %v400_v49 = vmul.f32 %v901_v0, %v143_v46 }
  0x4e   :  { %651 = vst [vmem:[#allocation7 + $0x380] sm:$0xff] %v395_v38  ;;  %652 = vst [vmem:[#allocation7 + $0x388] sm:$0xff] %v396_v39  ;;  %v401_v50 = vmul.f32 %v901_v0, %v144_v47  ;;  %v402_v51 = vmul.f32 %v901_v0, %v145_v48  ;;  %v146_v52 = vld [vmem:[#allocation4 + $0x3c0] sm:$0xff]  ;;  %v147_v53 = vld [vmem:[#allocation4 + $0x3c8] sm:$0xff] }
  0x4f   :  { %v148_v54 = vld [vmem:[#allocation4 + $0x3d0] sm:$0xff]  ;;  %653 = vst [vmem:[#allocation7 + $0x390] sm:$0xff] %v397_v43  ;;  %654 = vst [vmem:[#allocation7 + $0x398] sm:$0xff] %v398_v44  ;;  %v403_v55 = vmul.f32 %v901_v0, %v146_v52  ;;  %v404_v56 = vmul.f32 %v901_v0, %v147_v53  ;;  %v149_v58 = vld [vmem:[#allocation4 + $0x3d8] sm:$0xff] }
  0x50   :  { %655 = vst [vmem:[#allocation7 + $0x3a0] sm:$0xff] %v399_v45  ;;  %v405_v57 = vmul.f32 %v901_v0, %v148_v54  ;;  %v150_v59 = vld [vmem:[#allocation4 + $0x3e0] sm:$0xff]  ;;  %v151_v60 = vld [vmem:[#allocation4 + $0x3e8] sm:$0xff]  ;;  %656 = vst [vmem:[#allocation7 + $0x3a8] sm:$0xff] %v400_v49  ;;  %v406_v61 = vmul.f32 %v901_v0, %v149_v58 }
  0x51   :  { %657 = vst [vmem:[#allocation7 + $0x3b0] sm:$0xff] %v401_v50  ;;  %658 = vst [vmem:[#allocation7 + $0x3b8] sm:$0xff] %v402_v51  ;;  %v407_v62 = vmul.f32 %v901_v0, %v150_v59  ;;  %v408_v63 = vmul.f32 %v901_v0, %v151_v60  ;;  %v152_v1 = vld [vmem:[#allocation4 + $0x3f0] sm:$0xff]  ;;  %v153_v2 = vld [vmem:[#allocation4 + $0x3f8] sm:$0xff] }
  0x52   :  { %v154_v3 = vld [vmem:[#allocation4 + $0x400] sm:$0xff]  ;;  %659 = vst [vmem:[#allocation7 + $0x3c0] sm:$0xff] %v403_v55  ;;  %660 = vst [vmem:[#allocation7 + $0x3c8] sm:$0xff] %v404_v56  ;;  %v409_v4 = vmul.f32 %v901_v0, %v152_v1  ;;  %v410_v5 = vmul.f32 %v901_v0, %v153_v2  ;;  %v155_v7 = vld [vmem:[#allocation4 + $0x408] sm:$0xff] }
  0x53   :  { %661 = vst [vmem:[#allocation7 + $0x3d0] sm:$0xff] %v405_v57  ;;  %v411_v6 = vmul.f32 %v901_v0, %v154_v3  ;;  %v156_v8 = vld [vmem:[#allocation4 + $0x410] sm:$0xff]  ;;  %v157_v9 = vld [vmem:[#allocation4 + $0x418] sm:$0xff]  ;;  %662 = vst [vmem:[#allocation7 + $0x3d8] sm:$0xff] %v406_v61  ;;  %v412_v10 = vmul.f32 %v901_v0, %v155_v7 }
  0x54   :  { %663 = vst [vmem:[#allocation7 + $0x3e0] sm:$0xff] %v407_v62  ;;  %664 = vst [vmem:[#allocation7 + $0x3e8] sm:$0xff] %v408_v63  ;;  %v413_v11 = vmul.f32 %v901_v0, %v156_v8  ;;  %v414_v12 = vmul.f32 %v901_v0, %v157_v9  ;;  %v158_v13 = vld [vmem:[#allocation4 + $0x420] sm:$0xff]  ;;  %v159_v14 = vld [vmem:[#allocation4 + $0x428] sm:$0xff] }
  0x55   :  { %v160_v15 = vld [vmem:[#allocation4 + $0x430] sm:$0xff]  ;;  %665 = vst [vmem:[#allocation7 + $0x3f0] sm:$0xff] %v409_v4  ;;  %666 = vst [vmem:[#allocation7 + $0x3f8] sm:$0xff] %v410_v5  ;;  %v415_v16 = vmul.f32 %v901_v0, %v158_v13  ;;  %v416_v17 = vmul.f32 %v901_v0, %v159_v14  ;;  %v161_v19 = vld [vmem:[#allocation4 + $0x438] sm:$0xff] }
  0x56   :  { %667 = vst [vmem:[#allocation7 + $0x400] sm:$0xff] %v411_v6  ;;  %v417_v18 = vmul.f32 %v901_v0, %v160_v15  ;;  %v162_v20 = vld [vmem:[#allocation4 + $0x440] sm:$0xff]  ;;  %v163_v21 = vld [vmem:[#allocation4 + $0x448] sm:$0xff]  ;;  %668 = vst [vmem:[#allocation7 + $0x408] sm:$0xff] %v412_v10  ;;  %v418_v22 = vmul.f32 %v901_v0, %v161_v19 }
  0x57   :  { %669 = vst [vmem:[#allocation7 + $0x410] sm:$0xff] %v413_v11  ;;  %670 = vst [vmem:[#allocation7 + $0x418] sm:$0xff] %v414_v12  ;;  %v419_v23 = vmul.f32 %v901_v0, %v162_v20  ;;  %v420_v24 = vmul.f32 %v901_v0, %v163_v21  ;;  %v164_v25 = vld [vmem:[#allocation4 + $0x450] sm:$0xff]  ;;  %v165_v26 = vld [vmem:[#allocation4 + $0x458] sm:$0xff] }
  0x58   :  { %v166_v27 = vld [vmem:[#allocation4 + $0x460] sm:$0xff]  ;;  %671 = vst [vmem:[#allocation7 + $0x420] sm:$0xff] %v415_v16  ;;  %672 = vst [vmem:[#allocation7 + $0x428] sm:$0xff] %v416_v17  ;;  %v421_v28 = vmul.f32 %v901_v0, %v164_v25  ;;  %v422_v29 = vmul.f32 %v901_v0, %v165_v26  ;;  %v167_v31 = vld [vmem:[#allocation4 + $0x468] sm:$0xff] }
  0x59   :  { %673 = vst [vmem:[#allocation7 + $0x430] sm:$0xff] %v417_v18  ;;  %v423_v30 = vmul.f32 %v901_v0, %v166_v27  ;;  %v168_v32 = vld [vmem:[#allocation4 + $0x470] sm:$0xff]  ;;  %v169_v33 = vld [vmem:[#allocation4 + $0x478] sm:$0xff]  ;;  %674 = vst [vmem:[#allocation7 + $0x438] sm:$0xff] %v418_v22  ;;  %v424_v34 = vmul.f32 %v901_v0, %v167_v31 }
  0x5a   :  { %675 = vst [vmem:[#allocation7 + $0x440] sm:$0xff] %v419_v23  ;;  %676 = vst [vmem:[#allocation7 + $0x448] sm:$0xff] %v420_v24  ;;  %v425_v35 = vmul.f32 %v901_v0, %v168_v32  ;;  %v426_v36 = vmul.f32 %v901_v0, %v169_v33  ;;  %v170_v37 = vld [vmem:[#allocation4 + $0x480] sm:$0xff]  ;;  %v171_v38 = vld [vmem:[#allocation4 + $0x488] sm:$0xff] }
  0x5b   :  { %v172_v39 = vld [vmem:[#allocation4 + $0x490] sm:$0xff]  ;;  %677 = vst [vmem:[#allocation7 + $0x450] sm:$0xff] %v421_v28  ;;  %678 = vst [vmem:[#allocation7 + $0x458] sm:$0xff] %v422_v29  ;;  %v427_v40 = vmul.f32 %v901_v0, %v170_v37  ;;  %v428_v41 = vmul.f32 %v901_v0, %v171_v38  ;;  %v173_v43 = vld [vmem:[#allocation4 + $0x498] sm:$0xff] }
  0x5c   :  { %679 = vst [vmem:[#allocation7 + $0x460] sm:$0xff] %v423_v30  ;;  %v429_v42 = vmul.f32 %v901_v0, %v172_v39  ;;  %v174_v44 = vld [vmem:[#allocation4 + $0x4a0] sm:$0xff]  ;;  %v175_v45 = vld [vmem:[#allocation4 + $0x4a8] sm:$0xff]  ;;  %680 = vst [vmem:[#allocation7 + $0x468] sm:$0xff] %v424_v34  ;;  %v430_v46 = vmul.f32 %v901_v0, %v173_v43 }
  0x5d   :  { %681 = vst [vmem:[#allocation7 + $0x470] sm:$0xff] %v425_v35  ;;  %682 = vst [vmem:[#allocation7 + $0x478] sm:$0xff] %v426_v36  ;;  %v431_v47 = vmul.f32 %v901_v0, %v174_v44  ;;  %v432_v48 = vmul.f32 %v901_v0, %v175_v45  ;;  %v176_v49 = vld [vmem:[#allocation4 + $0x4b0] sm:$0xff]  ;;  %v177_v50 = vld [vmem:[#allocation4 + $0x4b8] sm:$0xff] }
  0x5e   :  { %v178_v51 = vld [vmem:[#allocation4 + $0x4c0] sm:$0xff]  ;;  %683 = vst [vmem:[#allocation7 + $0x480] sm:$0xff] %v427_v40  ;;  %684 = vst [vmem:[#allocation7 + $0x488] sm:$0xff] %v428_v41  ;;  %v433_v52 = vmul.f32 %v901_v0, %v176_v49  ;;  %v434_v53 = vmul.f32 %v901_v0, %v177_v50  ;;  %v179_v55 = vld [vmem:[#allocation4 + $0x4c8] sm:$0xff] }
  0x5f   :  { %685 = vst [vmem:[#allocation7 + $0x490] sm:$0xff] %v429_v42  ;;  %v435_v54 = vmul.f32 %v901_v0, %v178_v51  ;;  %v180_v56 = vld [vmem:[#allocation4 + $0x4d0] sm:$0xff]  ;;  %v181_v57 = vld [vmem:[#allocation4 + $0x4d8] sm:$0xff]  ;;  %686 = vst [vmem:[#allocation7 + $0x498] sm:$0xff] %v430_v46  ;;  %v436_v58 = vmul.f32 %v901_v0, %v179_v55 }
  0x60   :  { %687 = vst [vmem:[#allocation7 + $0x4a0] sm:$0xff] %v431_v47  ;;  %688 = vst [vmem:[#allocation7 + $0x4a8] sm:$0xff] %v432_v48  ;;  %v437_v59 = vmul.f32 %v901_v0, %v180_v56  ;;  %v438_v60 = vmul.f32 %v901_v0, %v181_v57  ;;  %v182_v61 = vld [vmem:[#allocation4 + $0x4e0] sm:$0xff]  ;;  %v183_v62 = vld [vmem:[#allocation4 + $0x4e8] sm:$0xff] }
  0x61   :  { %v184_v63 = vld [vmem:[#allocation4 + $0x4f0] sm:$0xff]  ;;  %689 = vst [vmem:[#allocation7 + $0x4b0] sm:$0xff] %v433_v52  ;;  %690 = vst [vmem:[#allocation7 + $0x4b8] sm:$0xff] %v434_v53  ;;  %v439_v1 = vmul.f32 %v901_v0, %v182_v61  ;;  %v440_v2 = vmul.f32 %v901_v0, %v183_v62  ;;  %v185_v4 = vld [vmem:[#allocation4 + $0x4f8] sm:$0xff] }
  0x62   :  { %691 = vst [vmem:[#allocation7 + $0x4c0] sm:$0xff] %v435_v54  ;;  %v441_v3 = vmul.f32 %v901_v0, %v184_v63  ;;  %v186_v5 = vld [vmem:[#allocation4 + $0x500] sm:$0xff]  ;;  %v187_v6 = vld [vmem:[#allocation4 + $0x508] sm:$0xff]  ;;  %692 = vst [vmem:[#allocation7 + $0x4c8] sm:$0xff] %v436_v58  ;;  %v442_v7 = vmul.f32 %v901_v0, %v185_v4 }
  0x63   :  { %693 = vst [vmem:[#allocation7 + $0x4d0] sm:$0xff] %v437_v59  ;;  %694 = vst [vmem:[#allocation7 + $0x4d8] sm:$0xff] %v438_v60  ;;  %v443_v8 = vmul.f32 %v901_v0, %v186_v5  ;;  %v444_v9 = vmul.f32 %v901_v0, %v187_v6  ;;  %v188_v10 = vld [vmem:[#allocation4 + $0x510] sm:$0xff]  ;;  %v189_v11 = vld [vmem:[#allocation4 + $0x518] sm:$0xff] }
  0x64   :  { %v190_v12 = vld [vmem:[#allocation4 + $0x520] sm:$0xff]  ;;  %695 = vst [vmem:[#allocation7 + $0x4e0] sm:$0xff] %v439_v1  ;;  %696 = vst [vmem:[#allocation7 + $0x4e8] sm:$0xff] %v440_v2  ;;  %v445_v13 = vmul.f32 %v901_v0, %v188_v10  ;;  %v446_v14 = vmul.f32 %v901_v0, %v189_v11  ;;  %v191_v16 = vld [vmem:[#allocation4 + $0x528] sm:$0xff] }
  0x65   :  { %697 = vst [vmem:[#allocation7 + $0x4f0] sm:$0xff] %v441_v3  ;;  %v447_v15 = vmul.f32 %v901_v0, %v190_v12  ;;  %v192_v17 = vld [vmem:[#allocation4 + $0x530] sm:$0xff]  ;;  %v193_v18 = vld [vmem:[#allocation4 + $0x538] sm:$0xff]  ;;  %698 = vst [vmem:[#allocation7 + $0x4f8] sm:$0xff] %v442_v7  ;;  %v448_v19 = vmul.f32 %v901_v0, %v191_v16 }
  0x66   :  { %699 = vst [vmem:[#allocation7 + $0x500] sm:$0xff] %v443_v8  ;;  %700 = vst [vmem:[#allocation7 + $0x508] sm:$0xff] %v444_v9  ;;  %v449_v20 = vmul.f32 %v901_v0, %v192_v17  ;;  %v450_v21 = vmul.f32 %v901_v0, %v193_v18  ;;  %v194_v22 = vld [vmem:[#allocation4 + $0x540] sm:$0xff]  ;;  %v195_v23 = vld [vmem:[#allocation4 + $0x548] sm:$0xff] }
  0x67   :  { %v196_v24 = vld [vmem:[#allocation4 + $0x550] sm:$0xff]  ;;  %701 = vst [vmem:[#allocation7 + $0x510] sm:$0xff] %v445_v13  ;;  %702 = vst [vmem:[#allocation7 + $0x518] sm:$0xff] %v446_v14  ;;  %v451_v25 = vmul.f32 %v901_v0, %v194_v22  ;;  %v452_v26 = vmul.f32 %v901_v0, %v195_v23  ;;  %v197_v28 = vld [vmem:[#allocation4 + $0x558] sm:$0xff] }
  0x68   :  { %703 = vst [vmem:[#allocation7 + $0x520] sm:$0xff] %v447_v15  ;;  %v453_v27 = vmul.f32 %v901_v0, %v196_v24  ;;  %v198_v29 = vld [vmem:[#allocation4 + $0x560] sm:$0xff]  ;;  %v199_v30 = vld [vmem:[#allocation4 + $0x568] sm:$0xff]  ;;  %704 = vst [vmem:[#allocation7 + $0x528] sm:$0xff] %v448_v19  ;;  %v454_v31 = vmul.f32 %v901_v0, %v197_v28 }
  0x69   :  { %705 = vst [vmem:[#allocation7 + $0x530] sm:$0xff] %v449_v20  ;;  %706 = vst [vmem:[#allocation7 + $0x538] sm:$0xff] %v450_v21  ;;  %v455_v32 = vmul.f32 %v901_v0, %v198_v29  ;;  %v456_v33 = vmul.f32 %v901_v0, %v199_v30  ;;  %v200_v34 = vld [vmem:[#allocation4 + $0x570] sm:$0xff]  ;;  %v201_v35 = vld [vmem:[#allocation4 + $0x578] sm:$0xff] }
  0x6a   :  { %v202_v36 = vld [vmem:[#allocation4 + $0x580] sm:$0xff]  ;;  %707 = vst [vmem:[#allocation7 + $0x540] sm:$0xff] %v451_v25  ;;  %708 = vst [vmem:[#allocation7 + $0x548] sm:$0xff] %v452_v26  ;;  %v457_v37 = vmul.f32 %v901_v0, %v200_v34  ;;  %v458_v38 = vmul.f32 %v901_v0, %v201_v35  ;;  %v203_v40 = vld [vmem:[#allocation4 + $0x588] sm:$0xff] }
  0x6b   :  { %709 = vst [vmem:[#allocation7 + $0x550] sm:$0xff] %v453_v27  ;;  %v459_v39 = vmul.f32 %v901_v0, %v202_v36  ;;  %v204_v41 = vld [vmem:[#allocation4 + $0x590] sm:$0xff]  ;;  %v205_v42 = vld [vmem:[#allocation4 + $0x598] sm:$0xff]  ;;  %710 = vst [vmem:[#allocation7 + $0x558] sm:$0xff] %v454_v31  ;;  %v460_v43 = vmul.f32 %v901_v0, %v203_v40 }
  0x6c   :  { %711 = vst [vmem:[#allocation7 + $0x560] sm:$0xff] %v455_v32  ;;  %712 = vst [vmem:[#allocation7 + $0x568] sm:$0xff] %v456_v33  ;;  %v461_v44 = vmul.f32 %v901_v0, %v204_v41  ;;  %v462_v45 = vmul.f32 %v901_v0, %v205_v42  ;;  %v206_v46 = vld [vmem:[#allocation4 + $0x5a0] sm:$0xff]  ;;  %v207_v47 = vld [vmem:[#allocation4 + $0x5a8] sm:$0xff] }
  0x6d   :  { %v208_v48 = vld [vmem:[#allocation4 + $0x5b0] sm:$0xff]  ;;  %713 = vst [vmem:[#allocation7 + $0x570] sm:$0xff] %v457_v37  ;;  %714 = vst [vmem:[#allocation7 + $0x578] sm:$0xff] %v458_v38  ;;  %v463_v49 = vmul.f32 %v901_v0, %v206_v46  ;;  %v464_v50 = vmul.f32 %v901_v0, %v207_v47  ;;  %v209_v52 = vld [vmem:[#allocation4 + $0x5b8] sm:$0xff] }
  0x6e   :  { %715 = vst [vmem:[#allocation7 + $0x580] sm:$0xff] %v459_v39  ;;  %v465_v51 = vmul.f32 %v901_v0, %v208_v48  ;;  %v210_v53 = vld [vmem:[#allocation4 + $0x5c0] sm:$0xff]  ;;  %v211_v54 = vld [vmem:[#allocation4 + $0x5c8] sm:$0xff]  ;;  %716 = vst [vmem:[#allocation7 + $0x588] sm:$0xff] %v460_v43  ;;  %v466_v55 = vmul.f32 %v901_v0, %v209_v52 }
  0x6f   :  { %717 = vst [vmem:[#allocation7 + $0x590] sm:$0xff] %v461_v44  ;;  %718 = vst [vmem:[#allocation7 + $0x598] sm:$0xff] %v462_v45  ;;  %v467_v56 = vmul.f32 %v901_v0, %v210_v53  ;;  %v468_v57 = vmul.f32 %v901_v0, %v211_v54  ;;  %v212_v58 = vld [vmem:[#allocation4 + $0x5d0] sm:$0xff]  ;;  %v213_v59 = vld [vmem:[#allocation4 + $0x5d8] sm:$0xff] }
  0x70   :  { %v214_v60 = vld [vmem:[#allocation4 + $0x5e0] sm:$0xff]  ;;  %719 = vst [vmem:[#allocation7 + $0x5a0] sm:$0xff] %v463_v49  ;;  %720 = vst [vmem:[#allocation7 + $0x5a8] sm:$0xff] %v464_v50  ;;  %v469_v61 = vmul.f32 %v901_v0, %v212_v58  ;;  %v470_v62 = vmul.f32 %v901_v0, %v213_v59  ;;  %v215_v1 = vld [vmem:[#allocation4 + $0x5e8] sm:$0xff] }
  0x71   :  { %721 = vst [vmem:[#allocation7 + $0x5b0] sm:$0xff] %v465_v51  ;;  %v471_v63 = vmul.f32 %v901_v0, %v214_v60  ;;  %v216_v2 = vld [vmem:[#allocation4 + $0x5f0] sm:$0xff]  ;;  %v217_v3 = vld [vmem:[#allocation4 + $0x5f8] sm:$0xff]  ;;  %722 = vst [vmem:[#allocation7 + $0x5b8] sm:$0xff] %v466_v55  ;;  %v472_v4 = vmul.f32 %v901_v0, %v215_v1 }
  0x72   :  { %723 = vst [vmem:[#allocation7 + $0x5c0] sm:$0xff] %v467_v56  ;;  %724 = vst [vmem:[#allocation7 + $0x5c8] sm:$0xff] %v468_v57  ;;  %v473_v5 = vmul.f32 %v901_v0, %v216_v2  ;;  %v474_v6 = vmul.f32 %v901_v0, %v217_v3  ;;  %v218_v7 = vld [vmem:[#allocation4 + $0x600] sm:$0xff]  ;;  %v219_v8 = vld [vmem:[#allocation4 + $0x608] sm:$0xff] }
  0x73   :  { %v220_v9 = vld [vmem:[#allocation4 + $0x610] sm:$0xff]  ;;  %725 = vst [vmem:[#allocation7 + $0x5d0] sm:$0xff] %v469_v61  ;;  %726 = vst [vmem:[#allocation7 + $0x5d8] sm:$0xff] %v470_v62  ;;  %v475_v10 = vmul.f32 %v901_v0, %v218_v7  ;;  %v476_v11 = vmul.f32 %v901_v0, %v219_v8  ;;  %v221_v13 = vld [vmem:[#allocation4 + $0x618] sm:$0xff] }
  0x74   :  { %727 = vst [vmem:[#allocation7 + $0x5e0] sm:$0xff] %v471_v63  ;;  %v477_v12 = vmul.f32 %v901_v0, %v220_v9  ;;  %v222_v14 = vld [vmem:[#allocation4 + $0x620] sm:$0xff]  ;;  %v223_v15 = vld [vmem:[#allocation4 + $0x628] sm:$0xff]  ;;  %728 = vst [vmem:[#allocation7 + $0x5e8] sm:$0xff] %v472_v4  ;;  %v478_v16 = vmul.f32 %v901_v0, %v221_v13 }
  0x75   :  { %729 = vst [vmem:[#allocation7 + $0x5f0] sm:$0xff] %v473_v5  ;;  %730 = vst [vmem:[#allocation7 + $0x5f8] sm:$0xff] %v474_v6  ;;  %v479_v17 = vmul.f32 %v901_v0, %v222_v14  ;;  %v480_v18 = vmul.f32 %v901_v0, %v223_v15  ;;  %v224_v19 = vld [vmem:[#allocation4 + $0x630] sm:$0xff]  ;;  %v225_v20 = vld [vmem:[#allocation4 + $0x638] sm:$0xff] }
  0x76   :  { %v226_v21 = vld [vmem:[#allocation4 + $0x640] sm:$0xff]  ;;  %731 = vst [vmem:[#allocation7 + $0x600] sm:$0xff] %v475_v10  ;;  %732 = vst [vmem:[#allocation7 + $0x608] sm:$0xff] %v476_v11  ;;  %v481_v22 = vmul.f32 %v901_v0, %v224_v19  ;;  %v482_v23 = vmul.f32 %v901_v0, %v225_v20  ;;  %v227_v25 = vld [vmem:[#allocation4 + $0x648] sm:$0xff] }
  0x77   :  { %733 = vst [vmem:[#allocation7 + $0x610] sm:$0xff] %v477_v12  ;;  %v483_v24 = vmul.f32 %v901_v0, %v226_v21  ;;  %v228_v26 = vld [vmem:[#allocation4 + $0x650] sm:$0xff]  ;;  %v229_v27 = vld [vmem:[#allocation4 + $0x658] sm:$0xff]  ;;  %734 = vst [vmem:[#allocation7 + $0x618] sm:$0xff] %v478_v16  ;;  %v484_v28 = vmul.f32 %v901_v0, %v227_v25 }
  0x78   :  { %735 = vst [vmem:[#allocation7 + $0x620] sm:$0xff] %v479_v17  ;;  %736 = vst [vmem:[#allocation7 + $0x628] sm:$0xff] %v480_v18  ;;  %v485_v29 = vmul.f32 %v901_v0, %v228_v26  ;;  %v486_v30 = vmul.f32 %v901_v0, %v229_v27  ;;  %v230_v31 = vld [vmem:[#allocation4 + $0x660] sm:$0xff]  ;;  %v231_v32 = vld [vmem:[#allocation4 + $0x668] sm:$0xff] }
  0x79   :  { %v232_v33 = vld [vmem:[#allocation4 + $0x670] sm:$0xff]  ;;  %737 = vst [vmem:[#allocation7 + $0x630] sm:$0xff] %v481_v22  ;;  %738 = vst [vmem:[#allocation7 + $0x638] sm:$0xff] %v482_v23  ;;  %v487_v34 = vmul.f32 %v901_v0, %v230_v31  ;;  %v488_v35 = vmul.f32 %v901_v0, %v231_v32  ;;  %v233_v37 = vld [vmem:[#allocation4 + $0x678] sm:$0xff] }
  0x7a   :  { %739 = vst [vmem:[#allocation7 + $0x640] sm:$0xff] %v483_v24  ;;  %v489_v36 = vmul.f32 %v901_v0, %v232_v33  ;;  %v234_v38 = vld [vmem:[#allocation4 + $0x680] sm:$0xff]  ;;  %v235_v39 = vld [vmem:[#allocation4 + $0x688] sm:$0xff]  ;;  %740 = vst [vmem:[#allocation7 + $0x648] sm:$0xff] %v484_v28  ;;  %v490_v40 = vmul.f32 %v901_v0, %v233_v37 }
  0x7b   :  { %741 = vst [vmem:[#allocation7 + $0x650] sm:$0xff] %v485_v29  ;;  %742 = vst [vmem:[#allocation7 + $0x658] sm:$0xff] %v486_v30  ;;  %v491_v41 = vmul.f32 %v901_v0, %v234_v38  ;;  %v492_v42 = vmul.f32 %v901_v0, %v235_v39  ;;  %v236_v43 = vld [vmem:[#allocation4 + $0x690] sm:$0xff]  ;;  %v237_v44 = vld [vmem:[#allocation4 + $0x698] sm:$0xff] }
  0x7c   :  { %v238_v45 = vld [vmem:[#allocation4 + $0x6a0] sm:$0xff]  ;;  %743 = vst [vmem:[#allocation7 + $0x660] sm:$0xff] %v487_v34  ;;  %744 = vst [vmem:[#allocation7 + $0x668] sm:$0xff] %v488_v35  ;;  %v493_v46 = vmul.f32 %v901_v0, %v236_v43  ;;  %v494_v47 = vmul.f32 %v901_v0, %v237_v44  ;;  %v239_v49 = vld [vmem:[#allocation4 + $0x6a8] sm:$0xff] }
  0x7d   :  { %745 = vst [vmem:[#allocation7 + $0x670] sm:$0xff] %v489_v36  ;;  %v495_v48 = vmul.f32 %v901_v0, %v238_v45  ;;  %v240_v50 = vld [vmem:[#allocation4 + $0x6b0] sm:$0xff]  ;;  %v241_v51 = vld [vmem:[#allocation4 + $0x6b8] sm:$0xff]  ;;  %746 = vst [vmem:[#allocation7 + $0x678] sm:$0xff] %v490_v40  ;;  %v496_v52 = vmul.f32 %v901_v0, %v239_v49 }
  0x7e   :  { %747 = vst [vmem:[#allocation7 + $0x680] sm:$0xff] %v491_v41  ;;  %748 = vst [vmem:[#allocation7 + $0x688] sm:$0xff] %v492_v42  ;;  %v497_v53 = vmul.f32 %v901_v0, %v240_v50  ;;  %v498_v54 = vmul.f32 %v901_v0, %v241_v51  ;;  %v242_v55 = vld [vmem:[#allocation4 + $0x6c0] sm:$0xff]  ;;  %v243_v56 = vld [vmem:[#allocation4 + $0x6c8] sm:$0xff] }
  0x7f   :  { %v244_v57 = vld [vmem:[#allocation4 + $0x6d0] sm:$0xff]  ;;  %749 = vst [vmem:[#allocation7 + $0x690] sm:$0xff] %v493_v46  ;;  %750 = vst [vmem:[#allocation7 + $0x698] sm:$0xff] %v494_v47  ;;  %v499_v58 = vmul.f32 %v901_v0, %v242_v55  ;;  %v500_v59 = vmul.f32 %v901_v0, %v243_v56  ;;  %v245_v61 = vld [vmem:[#allocation4 + $0x6d8] sm:$0xff] }
  0x80   :  { %751 = vst [vmem:[#allocation7 + $0x6a0] sm:$0xff] %v495_v48  ;;  %v501_v60 = vmul.f32 %v901_v0, %v244_v57  ;;  %v246_v62 = vld [vmem:[#allocation4 + $0x6e0] sm:$0xff]  ;;  %v247_v63 = vld [vmem:[#allocation4 + $0x6e8] sm:$0xff]  ;;  %752 = vst [vmem:[#allocation7 + $0x6a8] sm:$0xff] %v496_v52  ;;  %v502_v1 = vmul.f32 %v901_v0, %v245_v61 }
  0x81   :  { %753 = vst [vmem:[#allocation7 + $0x6b0] sm:$0xff] %v497_v53  ;;  %754 = vst [vmem:[#allocation7 + $0x6b8] sm:$0xff] %v498_v54  ;;  %v503_v2 = vmul.f32 %v901_v0, %v246_v62  ;;  %v504_v3 = vmul.f32 %v901_v0, %v247_v63  ;;  %v248_v4 = vld [vmem:[#allocation4 + $0x6f0] sm:$0xff]  ;;  %v249_v5 = vld [vmem:[#allocation4 + $0x6f8] sm:$0xff] }
  0x82   :  { %v250_v6 = vld [vmem:[#allocation4 + $0x700] sm:$0xff]  ;;  %755 = vst [vmem:[#allocation7 + $0x6c0] sm:$0xff] %v499_v58  ;;  %756 = vst [vmem:[#allocation7 + $0x6c8] sm:$0xff] %v500_v59  ;;  %v505_v7 = vmul.f32 %v901_v0, %v248_v4  ;;  %v506_v8 = vmul.f32 %v901_v0, %v249_v5  ;;  %v251_v10 = vld [vmem:[#allocation4 + $0x708] sm:$0xff] }
  0x83   :  { %757 = vst [vmem:[#allocation7 + $0x6d0] sm:$0xff] %v501_v60  ;;  %v507_v9 = vmul.f32 %v901_v0, %v250_v6  ;;  %v252_v11 = vld [vmem:[#allocation4 + $0x710] sm:$0xff]  ;;  %v253_v12 = vld [vmem:[#allocation4 + $0x718] sm:$0xff]  ;;  %758 = vst [vmem:[#allocation7 + $0x6d8] sm:$0xff] %v502_v1  ;;  %v508_v13 = vmul.f32 %v901_v0, %v251_v10 }
  0x84   :  { %759 = vst [vmem:[#allocation7 + $0x6e0] sm:$0xff] %v503_v2  ;;  %760 = vst [vmem:[#allocation7 + $0x6e8] sm:$0xff] %v504_v3  ;;  %v509_v14 = vmul.f32 %v901_v0, %v252_v11  ;;  %v510_v15 = vmul.f32 %v901_v0, %v253_v12  ;;  %v254_v16 = vld [vmem:[#allocation4 + $0x720] sm:$0xff]  ;;  %v255_v17 = vld [vmem:[#allocation4 + $0x728] sm:$0xff] }
  0x85   :  { %v256_v18 = vld [vmem:[#allocation4 + $0x730] sm:$0xff]  ;;  %761 = vst [vmem:[#allocation7 + $0x6f0] sm:$0xff] %v505_v7  ;;  %762 = vst [vmem:[#allocation7 + $0x6f8] sm:$0xff] %v506_v8  ;;  %v511_v19 = vmul.f32 %v901_v0, %v254_v16  ;;  %v512_v20 = vmul.f32 %v901_v0, %v255_v17  ;;  %v257_v22 = vld [vmem:[#allocation4 + $0x738] sm:$0xff] }
  0x86   :  { %763 = vst [vmem:[#allocation7 + $0x700] sm:$0xff] %v507_v9  ;;  %v513_v21 = vmul.f32 %v901_v0, %v256_v18  ;;  %v258_v23 = vld [vmem:[#allocation4 + $0x740] sm:$0xff]  ;;  %v259_v24 = vld [vmem:[#allocation4 + $0x748] sm:$0xff]  ;;  %764 = vst [vmem:[#allocation7 + $0x708] sm:$0xff] %v508_v13  ;;  %v514_v25 = vmul.f32 %v901_v0, %v257_v22 }
  0x87   :  { %765 = vst [vmem:[#allocation7 + $0x710] sm:$0xff] %v509_v14  ;;  %766 = vst [vmem:[#allocation7 + $0x718] sm:$0xff] %v510_v15  ;;  %v515_v26 = vmul.f32 %v901_v0, %v258_v23  ;;  %v516_v27 = vmul.f32 %v901_v0, %v259_v24  ;;  %v260_v28 = vld [vmem:[#allocation4 + $0x750] sm:$0xff]  ;;  %v261_v29 = vld [vmem:[#allocation4 + $0x758] sm:$0xff] }
  0x88   :  { %v262_v30 = vld [vmem:[#allocation4 + $0x760] sm:$0xff]  ;;  %767 = vst [vmem:[#allocation7 + $0x720] sm:$0xff] %v511_v19  ;;  %768 = vst [vmem:[#allocation7 + $0x728] sm:$0xff] %v512_v20  ;;  %v517_v31 = vmul.f32 %v901_v0, %v260_v28  ;;  %v518_v32 = vmul.f32 %v901_v0, %v261_v29  ;;  %v263_v34 = vld [vmem:[#allocation4 + $0x768] sm:$0xff] }
  0x89   :  { %769 = vst [vmem:[#allocation7 + $0x730] sm:$0xff] %v513_v21  ;;  %v519_v33 = vmul.f32 %v901_v0, %v262_v30  ;;  %v264_v35 = vld [vmem:[#allocation4 + $0x770] sm:$0xff]  ;;  %v265_v36 = vld [vmem:[#allocation4 + $0x778] sm:$0xff]  ;;  %770 = vst [vmem:[#allocation7 + $0x738] sm:$0xff] %v514_v25  ;;  %v520_v37 = vmul.f32 %v901_v0, %v263_v34 }
  0x8a   :  { %771 = vst [vmem:[#allocation7 + $0x740] sm:$0xff] %v515_v26  ;;  %772 = vst [vmem:[#allocation7 + $0x748] sm:$0xff] %v516_v27  ;;  %v521_v38 = vmul.f32 %v901_v0, %v264_v35  ;;  %v522_v39 = vmul.f32 %v901_v0, %v265_v36  ;;  %v266_v40 = vld [vmem:[#allocation4 + $0x780] sm:$0xff]  ;;  %v267_v41 = vld [vmem:[#allocation4 + $0x788] sm:$0xff] }
  0x8b   :  { %v268_v42 = vld [vmem:[#allocation4 + $0x790] sm:$0xff]  ;;  %773 = vst [vmem:[#allocation7 + $0x750] sm:$0xff] %v517_v31  ;;  %774 = vst [vmem:[#allocation7 + $0x758] sm:$0xff] %v518_v32  ;;  %v523_v43 = vmul.f32 %v901_v0, %v266_v40  ;;  %v524_v44 = vmul.f32 %v901_v0, %v267_v41  ;;  %v269_v46 = vld [vmem:[#allocation4 + $0x798] sm:$0xff] }
  0x8c   :  { %775 = vst [vmem:[#allocation7 + $0x760] sm:$0xff] %v519_v33  ;;  %v525_v45 = vmul.f32 %v901_v0, %v268_v42  ;;  %v270_v47 = vld [vmem:[#allocation4 + $0x7a0] sm:$0xff]  ;;  %v271_v48 = vld [vmem:[#allocation4 + $0x7a8] sm:$0xff]  ;;  %776 = vst [vmem:[#allocation7 + $0x768] sm:$0xff] %v520_v37  ;;  %v526_v49 = vmul.f32 %v901_v0, %v269_v46 }
  0x8d   :  { %777 = vst [vmem:[#allocation7 + $0x770] sm:$0xff] %v521_v38  ;;  %778 = vst [vmem:[#allocation7 + $0x778] sm:$0xff] %v522_v39  ;;  %v527_v50 = vmul.f32 %v901_v0, %v270_v47  ;;  %v528_v51 = vmul.f32 %v901_v0, %v271_v48  ;;  %v272_v52 = vld [vmem:[#allocation4 + $0x7b0] sm:$0xff]  ;;  %v273_v53 = vld [vmem:[#allocation4 + $0x7b8] sm:$0xff] }
  0x8e   :  { %v274_v54 = vld [vmem:[#allocation4 + $0x7c0] sm:$0xff]  ;;  %779 = vst [vmem:[#allocation7 + $0x780] sm:$0xff] %v523_v43  ;;  %780 = vst [vmem:[#allocation7 + $0x788] sm:$0xff] %v524_v44  ;;  %v529_v55 = vmul.f32 %v901_v0, %v272_v52  ;;  %v530_v56 = vmul.f32 %v901_v0, %v273_v53  ;;  %v275_v58 = vld [vmem:[#allocation4 + $0x7c8] sm:$0xff] }
  0x8f   :  { %781 = vst [vmem:[#allocation7 + $0x790] sm:$0xff] %v525_v45  ;;  %v531_v57 = vmul.f32 %v901_v0, %v274_v54  ;;  %v276_v59 = vld [vmem:[#allocation4 + $0x7d0] sm:$0xff]  ;;  %v277_v60 = vld [vmem:[#allocation4 + $0x7d8] sm:$0xff]  ;;  %782 = vst [vmem:[#allocation7 + $0x798] sm:$0xff] %v526_v49  ;;  %v532_v61 = vmul.f32 %v901_v0, %v275_v58 }
  0x90   :  { %783 = vst [vmem:[#allocation7 + $0x7a0] sm:$0xff] %v527_v50  ;;  %784 = vst [vmem:[#allocation7 + $0x7a8] sm:$0xff] %v528_v51  ;;  %v533_v62 = vmul.f32 %v901_v0, %v276_v59  ;;  %v534_v63 = vmul.f32 %v901_v0, %v277_v60  ;;  %v278_v1 = vld [vmem:[#allocation4 + $0x7e0] sm:$0xff]  ;;  %v279_v2 = vld [vmem:[#allocation4 + $0x7e8] sm:$0xff] }
  0x91   :  { %v280_v3 = vld [vmem:[#allocation4 + $0x7f0] sm:$0xff]  ;;  %785 = vst [vmem:[#allocation7 + $0x7b0] sm:$0xff] %v529_v55  ;;  %786 = vst [vmem:[#allocation7 + $0x7b8] sm:$0xff] %v530_v56  ;;  %v535_v4 = vmul.f32 %v901_v0, %v278_v1  ;;  %v536_v5 = vmul.f32 %v901_v0, %v279_v2  ;;  %v281_v7 = vld [vmem:[#allocation4 + $0x7f8] sm:$0xff] }
  0x92   :  { %787 = vst [vmem:[#allocation7 + $0x7c0] sm:$0xff] %v531_v57  ;;  %v537_v6 = vmul.f32 %v901_v0, %v280_v3  ;;  %788 = vst [vmem:[#allocation7 + $0x7c8] sm:$0xff] %v532_v61  ;;  %v538_v8 = vmul.f32 %v901_v0, %v281_v7 }
  0x93   :  { %789 = vst [vmem:[#allocation7 + $0x7d0] sm:$0xff] %v533_v62  ;;  %790 = vst [vmem:[#allocation7 + $0x7d8] sm:$0xff] %v534_v63 }
  0x94   :  { %791 = vst [vmem:[#allocation7 + $0x7e0] sm:$0xff] %v535_v4  ;;  %792 = vst [vmem:[#allocation7 + $0x7e8] sm:$0xff] %v536_v5 }
  0x95   :  { %793 = vst [vmem:[#allocation7 + $0x7f0] sm:$0xff] %v537_v6  ;;  %794 = vst [vmem:[#allocation7 + $0x7f8] sm:$0xff] %v538_v8 }
  0x96   :  { %849 = shalt.err (!%p846_p12)
}
  0x97   :  { %s850_s28 = scalar_lea.hbm %s1176_s2, 32768 }
  0x98   :  { %p851_p13 = scmp.ne.s32.totalorder %s1176_s2, %s850_s28  ;;  %p854_p0 = scmp.lt.u32.totalorder %s850_s28, %s1176_s2 }
  0x9a   :  { %p856_p1 = pnand %p854_p0, %p851_p13 }
  0x9c   :  { %859 = shalt.err (!%p856_p1)
}
  0x9d   :  { %806 = dma.vmem_to_hbm [thread:$0]  %s801_s1, 32768, %s1176_s2, [#allocation6], %s865_s19, %s865_s19, %s866_s20  }
  0x9e   :  { %862 = dma.done.wait [#allocation6], 32768  }
  0x9f   :  { %863 = vsyncadd [#allocation6], 4294934528 }
  0xa0   :  { %810 = vsyncpa [#allocation5], 1 }
  0xa1   :  { %811 = vsyncpa [#allocation6], 1 }

</bundles_post_ra>
